<compile_context>
chip_gen: v6e
topology: v6e:2x2x1
jax: 0.10.0
libtpu: 0.0.40
codegen_flags: <defaults>
</compile_context>

<pallas_src>
import jax
import jax.numpy as jnp
from jax.experimental import pallas as pl
from jax.experimental.pallas import tpu as pltpu


_TILE_N_DEFAULT = 32768   # rows per grid step; ~5 MiB double-buffered f32 in+out
_SMALL_N_CUTOFF = 128     # below this, plain XLA fusion beats a standalone pallas_call
_MIN_SPLIT_ROWS = 2048    # only split the grid (for v7x megacore) when each half
                          # still amortizes the ~0.35 us per-step overhead


def _round_up(n, m):
    return ((n + m - 1) // m) * m


def _round_down(n, m):
    return (n // m) * m


def fuse_weights(w_list0, w_dict1):
    """W = param_list[0] @ param_dict['weight1'].

    Both are constant module parameters, so fold them ONCE when parameters are
    created (outside the per-call forward path)."""
    return jnp.dot(w_list0, w_dict1, preferred_element_type=jnp.float32)


def _fused_mm_kernel(x_ref, w_ref, o_ref):
    # One MXU matmul per row tile, f32 accumulation.  The fused 10x10 weight
    # maps to the same block on every grid step, so it stays VMEM-resident.
    o_ref[...] = jnp.dot(
        x_ref[...], w_ref[...], preferred_element_type=jnp.float32
    ).astype(o_ref.dtype)


def my_model_forward(x, w_fused, *, tile_n=_TILE_N_DEFAULT):
    """Pallas equivalent of MyModel.forward with the weights pre-fused.

    x:        (N, 10)
    w_fused:  (10, 10) float32 = param_list[0] @ param_dict['weight1']
    returns:  (N, 10), dtype of x (f32 accumulation inside the kernel; if x is
              bf16 the weight stays f32 and the dot promotes — intended).
    """
    n, k = x.shape
    out_dim = w_fused.shape[1]

    if n < _SMALL_N_CUTOFF:
        # Tiny batch: kernel launch + grid-step overhead dwarf the work.
        return jnp.dot(x, w_fused, preferred_element_type=jnp.float32).astype(x.dtype)

    # --- Row-tile selection (natural layout, no padding of the array) ---
    target = tile_n
    if n >= _MIN_SPLIT_ROWS:
        # Guarantee >=2 grid steps so the "parallel" axis feeds both v7x TCs.
        target = min(target, _round_up(pl.cdiv(n, 2), 8))
    if target >= n:
        # Single block covering the whole batch: block dim == full array dim
        # is always legal (no multiple-of-8 requirement needed).
        tile = n
    else:
        # Multi-step grid: block second-to-last dim must be a multiple of 8;
        # the partial tail block (if any) is masked by Pallas.
        tile = max(8, _round_down(target, 8))
    grid = (pl.cdiv(n, tile),)

    itemsize = jnp.dtype(x.dtype).itemsize
    cost = pl.CostEstimate(
        flops=2 * n * k * out_dim,
        transcendentals=0,
        bytes_accessed=n * k * itemsize + k * out_dim * 4 + n * out_dim * itemsize,
    )

    return pl.pallas_call(
        _fused_mm_kernel,
        out_shape=jax.ShapeDtypeStruct((n, out_dim), x.dtype),
        grid=grid,
        in_specs=[
            pl.BlockSpec((tile, k), lambda i: (i, 0)),       # x row tiles
            pl.BlockSpec((k, out_dim), lambda i: (0, 0)),    # fused weight (resident)
        ],
        out_specs=pl.BlockSpec((tile, out_dim), lambda i: (i, 0)),
        compiler_params=pltpu.CompilerParams(
            # Row tiles are independent -> shard across v7x's 2 TensorCores.
            # Tile capped at 32768 keeps double-buffered footprint ~5 MiB, so
            # the default scoped-VMEM limit is fine on v5e/v6e/v7x.
            dimension_semantics=("parallel",),
        ),
        cost_estimate=cost,
    )(x, w_fused)


def my_model_forward_unfused(x, w_list0, w_dict1, *, tile_n=_TILE_N_DEFAULT):
    """Signature-compatible with MyModel.forward; prefer fuse_weights() once +
    my_model_forward() in steady state."""
    return my_model_forward(x, fuse_weights(w_list0, w_dict1), tile_n=tile_n)


def init_params(key):
    """Deterministic stand-ins for the torch.randn parameters in __init__."""
    k0, k1, k2, k3 = jax.random.split(key, 4)
    return {
        "param_list_0": jax.random.normal(k0, (10, 10), jnp.float32),
        "param_list_1": jax.random.normal(k1, (10, 10), jnp.float32),  # unused in forward
        "weight1": jax.random.normal(k2, (10, 10), jnp.float32),
        "weight2": jax.random.normal(k3, (20, 20), jnp.float32),       # unused in forward
    }


if __name__ == "__main__":
    key = jax.random.PRNGKey(0)
    pkey, kbig, kragged, ksmall = jax.random.split(key, 4)
    params = init_params(pkey)
    w1 = params["param_list_0"]
    w2 = params["weight1"]

    # Fuse the constant weights once, outside the per-call path.
    w_fused = fuse_weights(w1, w2)
    fwd = jax.jit(my_model_forward)

    # 1) Batch large enough to take the Pallas path (single full-array block).
    x_big = jax.random.normal(kbig, (256, 10), jnp.float32)
    out_big = jax.block_until_ready(fwd(x_big, w_fused))
    ref_big = (x_big @ w1) @ w2
    assert out_big.shape == (256, 10)
    assert jnp.allclose(out_big, ref_big, atol=1e-3, rtol=1e-3)

    # 2) Ragged batch (not a multiple of 8): block == full array dims path.
    x_rag = jax.random.normal(kragged, (250, 10), jnp.float32)
    out_rag = jax.block_until_ready(fwd(x_rag, w_fused))
    ref_rag = (x_rag @ w1) @ w2
    assert out_rag.shape == (250, 10)
    assert jnp.allclose(out_rag, ref_rag, atol=1e-3, rtol=1e-3)

    # 3) Tiny batch: XLA fallback path (same semantics).
    x_small = jax.random.normal(ksmall, (8, 10), jnp.float32)
    out_small = jax.block_until_ready(fwd(x_small, w_fused))
    ref_small = (x_small @ w1) @ w2
    assert out_small.shape == (8, 10)
    assert jnp.allclose(out_small, ref_small, atol=1e-3, rtol=1e-3)

    print("KERNEL_OK")
</pallas_src>

<mosaic_0001>
module attributes {stable_mosaic.version = 11 : i64} {
  func.func @_fused_mm_kernel(%arg0: i32, %arg1: memref<256x10xf32, #tpu.memory_space<vmem>>, %arg2: memref<10x10xf32, #tpu.memory_space<vmem>>, %arg3: memref<256x10xf32, #tpu.memory_space<vmem>>) attributes {dimension_semantics = [#tpu.dimension_semantics<parallel>], iteration_bounds = array<i64: 1>, scalar_prefetch = 0 : i64, scratch_operands = 0 : i64, tpu.core_type = #tpu.core_type<tc>, window_params = [{transform_indices = @transform_0, window_bounds = array<i64: 256, 10>}, {pipeline_mode = #tpu.pipeline_mode<synchronous>, transform_indices = @transform_1, window_bounds = array<i64: 10, 10>}, {transform_indices = @transform_2, window_bounds = array<i64: 256, 10>}]} {
    %c0 = arith.constant 0 : index
    %c0_0 = arith.constant 0 : index
    %0 = vector.load %arg1[%c0, %c0_0] : memref<256x10xf32, #tpu.memory_space<vmem>>, vector<256x10xf32>
    %c0_1 = arith.constant 0 : index
    %c0_2 = arith.constant 0 : index
    %1 = vector.load %arg2[%c0_1, %c0_2] : memref<10x10xf32, #tpu.memory_space<vmem>>, vector<10x10xf32>
    %cst = arith.constant dense<0.000000e+00> : vector<256x10xf32>
    %2 = tpu.matmul %0, %1, %cst {dimension_numbers = #tpu.dot_dimension_numbers<[1], [0], [0], [1], [0, 0, 1, 1], [], []>} : vector<256x10xf32>, vector<10x10xf32>, vector<256x10xf32> -> vector<256x10xf32>
    %c0_3 = arith.constant 0 : index
    %c0_4 = arith.constant 0 : index
    %3 = vector.load %arg3[%c0_3, %c0_4] : memref<256x10xf32, #tpu.memory_space<vmem>>, vector<256x10xf32>
    tpu.vector_store %arg3[%c0_3, %c0_4], %2 {strides = array<i32>} : memref<256x10xf32, #tpu.memory_space<vmem>>, vector<256x10xf32>,
    return
  }
  func.func @transform_0(%arg0: i32) -> (i32, i32) {
    %c0_i32 = arith.constant 0 : i32
    %c0_i32_0 = arith.constant 0 : i32
    return %arg0, %c0_i32 : i32, i32
  }
  func.func @transform_1(%arg0: i32) -> (i32, i32) {
    %c0_i32 = arith.constant 0 : i32
    %c0_i32_0 = arith.constant 0 : i32
    %c0_i32_1 = arith.constant 0 : i32
    return %c0_i32, %c0_i32_0 : i32, i32
  }
  func.func @transform_2(%arg0: i32) -> (i32, i32) {
    %c0_i32 = arith.constant 0 : i32
    %c0_i32_0 = arith.constant 0 : i32
    return %arg0, %c0_i32 : i32, i32
  }
}

</mosaic_0001>

<bundles_post_ra>
// kernel: my_model_forward.1
= control target key start
LH: loop header
LB: loop body
LE: loop exit
PB: predicated region body
PF: predicated region fallthrough
CT: control target
= control target key end

     0   :  { %vm142_vm0 = vcmask 1041408   ;;  %vm45_vm1 = vcmask 80896   ;;  %s807_s1 = inlined_call_operand.vmem [shape: f32[10,10], index: 1, kind: input, shape index: {}]   ;;  %s808_s0 = inlined_call_operand.vmem [shape: f32[256,10], index: 0, kind: input, shape index: {}]   ;;  %s809_s2 = inlined_call_operand.vmem [shape: f32[256,10], index: 2, kind: output, shape index: {}]  }
   0x1   :  { %v44_v0 = vld [vmem:[%s807_s1 + $0x8] sm:$0x3]  ;;  %v43_v1 = vld [vmem:[%s807_s1] sm:$0xff]  ;;  %v13_v6 = vld [vmem:[%s808_s0 + $0x10] sm:$0xff] }
   0x2   :  { %474 = vmatprep.subr.msk.mxu0 %vm142_vm0, %v44_v0  ;;  %526 = vmatprep.subr.msk.mxu1 %vm142_vm0, %v44_v0  ;;  %v11_v2 = vld [vmem:[%s808_s0] sm:$0xff]  ;;  %v12_v4 = vld [vmem:[%s808_s0 + $0x8] sm:$0xff]  ;;  %v29_v7 = vld [vmem:[%s808_s0 + $0x90] sm:$0xff] }
   0x3   :  { %475 = vmatpush3.msk.msra.mxu0 %vm142_vm0, %v44_v0  ;;  %528 = vmatpush3.msk.msra.mxu1 %vm142_vm0, %v44_v0  ;;  %v27_v3 = vld [vmem:[%s808_s0 + $0x80] sm:$0xff]  ;;  %v28_v5 = vld [vmem:[%s808_s0 + $0x88] sm:$0xff]  ;;  %v14_v8 = vld [vmem:[%s808_s0 + $0x18] sm:$0xff] }
   0x4   :  { %476 = vmatprep.subr.mxu0 %v43_v1  ;;  %527 = vmatprep.subr.mxu1 %v43_v1  ;;  %v30_v9 = vld [vmem:[%s808_s0 + $0x98] sm:$0xff]  ;;  %v15_v10 = vld [vmem:[%s808_s0 + $0x20] sm:$0xff]  ;;  %v16_v12 = vld [vmem:[%s808_s0 + $0x28] sm:$0xff] }
   0x5   :  { %477 = vmatpush3.msra.mxu0 %v43_v1  ;;  %529 = vmatpush3.msra.mxu1 %v43_v1  ;;  %v31_v11 = vld [vmem:[%s808_s0 + $0xa0] sm:$0xff]  ;;  %v32_v13 = vld [vmem:[%s808_s0 + $0xa8] sm:$0xff]  ;;  %v17_v14 = vld [vmem:[%s808_s0 + $0x30] sm:$0xff] }
   0x6   :  { %478 = vmatprep.mubr.msk.f32.mxu0 %vm45_vm1, %v11_v2  ;;  %502 = vmatprep.mubr.msk.f32.mxu1 %vm45_vm1, %v27_v3  ;;  %v33_v15 = vld [vmem:[%s808_s0 + $0xb0] sm:$0xff]  ;;  %v18_v16 = vld [vmem:[%s808_s0 + $0x38] sm:$0xff]  ;;  %v19_v18 = vld [vmem:[%s808_s0 + $0x40] sm:$0xff] }
   0x7   :  { %479 = vmatmul.mubr.msk.f32.vlgmr.msra.gmra.mxu0 %vm45_vm1, %v12_v4  ;;  %503 = vmatmul.mubr.msk.f32.vlgmr.msra.gmra.mxu1 %vm45_vm1, %v28_v5  ;;  %v34_v17 = vld [vmem:[%s808_s0 + $0xb8] sm:$0xff]  ;;  %v35_v19 = vld [vmem:[%s808_s0 + $0xc0] sm:$0xff]  ;;  %v20_v20 = vld [vmem:[%s808_s0 + $0x48] sm:$0xff] }
   0x8   :  { %481 = vmatprep.mubr.msk.f32.mxu0 %vm45_vm1, %v13_v6  ;;  %505 = vmatprep.mubr.msk.f32.mxu1 %vm45_vm1, %v29_v7  ;;  %v36_v21 = vld [vmem:[%s808_s0 + $0xc8] sm:$0xff]  ;;  %v21_v22 = vld [vmem:[%s808_s0 + $0x50] sm:$0xff]  ;;  %v22_v24 = vld [vmem:[%s808_s0 + $0x58] sm:$0xff] }
   0x9   :  { %v37_v23 = vld [vmem:[%s808_s0 + $0xd0] sm:$0xff]  ;;  %v38_v25 = vld [vmem:[%s808_s0 + $0xd8] sm:$0xff]  ;;  %v23_v26 = vld [vmem:[%s808_s0 + $0x60] sm:$0xff] }
   0xa   :  { %v39_v27 = vld [vmem:[%s808_s0 + $0xe0] sm:$0xff]  ;;  %v24_v28 = vld [vmem:[%s808_s0 + $0x68] sm:$0xff]  ;;  %v25_v30 = vld [vmem:[%s808_s0 + $0x70] sm:$0xff] }
   0xb   :  { %482 = vmatmul.mubr.msk.f32.gmra.mxu0 %vm45_vm1, %v14_v8  ;;  %506 = vmatmul.mubr.msk.f32.gmra.mxu1 %vm45_vm1, %v30_v9  ;;  %v40_v29 = vld [vmem:[%s808_s0 + $0xe8] sm:$0xff]  ;;  %v41_v31 = vld [vmem:[%s808_s0 + $0xf0] sm:$0xff]  ;;  %v26_v32 = vld [vmem:[%s808_s0 + $0x78] sm:$0xff] }
   0xc   :  { %484 = vmatprep.mubr.msk.f32.mxu0 %vm45_vm1, %v15_v10  ;;  %508 = vmatprep.mubr.msk.f32.mxu1 %vm45_vm1, %v31_v11  ;;  %v42_v33 = vld [vmem:[%s808_s0 + $0xf8] sm:$0xff] }
   0xf   :  { %485 = vmatmul.mubr.msk.f32.gmra.mxu0 %vm45_vm1, %v16_v12  ;;  %509 = vmatmul.mubr.msk.f32.gmra.mxu1 %vm45_vm1, %v32_v13 }
  0x10   :  { %487 = vmatprep.mubr.msk.f32.mxu0 %vm45_vm1, %v17_v14  ;;  %511 = vmatprep.mubr.msk.f32.mxu1 %vm45_vm1, %v33_v15 }
  0x13   :  { %488 = vmatmul.mubr.msk.f32.gmra.mxu0 %vm45_vm1, %v18_v16  ;;  %512 = vmatmul.mubr.msk.f32.gmra.mxu1 %vm45_vm1, %v34_v17 }
  0x14   :  { %490 = vmatprep.mubr.msk.f32.mxu0 %vm45_vm1, %v19_v18  ;;  %514 = vmatprep.mubr.msk.f32.mxu1 %vm45_vm1, %v35_v19 }
  0x17   :  { %491 = vmatmul.mubr.msk.f32.gmra.mxu0 %vm45_vm1, %v20_v20  ;;  %515 = vmatmul.mubr.msk.f32.gmra.mxu1 %vm45_vm1, %v36_v21 }
  0x18   :  { %493 = vmatprep.mubr.msk.f32.mxu0 %vm45_vm1, %v21_v22  ;;  %517 = vmatprep.mubr.msk.f32.mxu1 %vm45_vm1, %v37_v23 }
  0x1b   :  { %494 = vmatmul.mubr.msk.f32.gmra.mxu0 %vm45_vm1, %v22_v24  ;;  %518 = vmatmul.mubr.msk.f32.gmra.mxu1 %vm45_vm1, %v38_v25 }
  0x1c   :  { %496 = vmatprep.mubr.msk.f32.mxu0 %vm45_vm1, %v23_v26  ;;  %520 = vmatprep.mubr.msk.f32.mxu1 %vm45_vm1, %v39_v27 }
  0x1f   :  { %497 = vmatmul.mubr.msk.f32.gmra.mxu0 %vm45_vm1, %v24_v28  ;;  %521 = vmatmul.mubr.msk.f32.gmra.mxu1 %vm45_vm1, %v40_v29 }
  0x20   :  { %499 = vmatprep.mubr.msk.f32.mxu0 %vm45_vm1, %v25_v30  ;;  %523 = vmatprep.mubr.msk.f32.mxu1 %vm45_vm1, %v41_v31 }
  0x23   :  { %500 = vmatmul.mubr.msk.f32.gmra.mxu0 %vm45_vm1, %v26_v32  ;;  %524 = vmatmul.mubr.msk.f32.gmra.mxu1 %vm45_vm1, %v42_v33 }
  0xc7   :  { %v480_v34 = vpop.f32.mrf.mxu0  ;;  %v504_v35 = vpop.f32.mrf.mxu1 }
  0xc8   :  { %372 = vst.msk [vmem:[%s809_s2 + $0x8] sm:$0xff] %vm45_vm1, %v480_v34  ;;  %388 = vst.msk [vmem:[%s809_s2 + $0x88] sm:$0xff] %vm45_vm1, %v504_v35 }
  0xc9   :  { %v212_v36 = vpop.f32.mrf.mxu0  ;;  %v292_v37 = vpop.f32.mrf.mxu1 }
  0xca   :  { %371 = vst.msk [vmem:[%s809_s2] sm:$0xff] %vm45_vm1, %v212_v36  ;;  %387 = vst.msk [vmem:[%s809_s2 + $0x80] sm:$0xff] %vm45_vm1, %v292_v37 }
  0xcb   :  { %v483_v38 = vpop.f32.mrf.mxu0  ;;  %v507_v39 = vpop.f32.mrf.mxu1 }
  0xcc   :  { %374 = vst.msk [vmem:[%s809_s2 + $0x18] sm:$0xff] %vm45_vm1, %v483_v38  ;;  %390 = vst.msk [vmem:[%s809_s2 + $0x98] sm:$0xff] %vm45_vm1, %v507_v39 }
  0xcd   :  { %v222_v40 = vpop.f32.mrf.mxu0  ;;  %v302_v41 = vpop.f32.mrf.mxu1 }
  0xce   :  { %373 = vst.msk [vmem:[%s809_s2 + $0x10] sm:$0xff] %vm45_vm1, %v222_v40  ;;  %389 = vst.msk [vmem:[%s809_s2 + $0x90] sm:$0xff] %vm45_vm1, %v302_v41 }
  0xcf   :  { %v486_v42 = vpop.f32.mrf.mxu0  ;;  %v510_v43 = vpop.f32.mrf.mxu1 }
  0xd0   :  { %376 = vst.msk [vmem:[%s809_s2 + $0x28] sm:$0xff] %vm45_vm1, %v486_v42  ;;  %392 = vst.msk [vmem:[%s809_s2 + $0xa8] sm:$0xff] %vm45_vm1, %v510_v43 }
  0xd1   :  { %v232_v44 = vpop.f32.mrf.mxu0  ;;  %v312_v45 = vpop.f32.mrf.mxu1 }
  0xd2   :  { %375 = vst.msk [vmem:[%s809_s2 + $0x20] sm:$0xff] %vm45_vm1, %v232_v44  ;;  %391 = vst.msk [vmem:[%s809_s2 + $0xa0] sm:$0xff] %vm45_vm1, %v312_v45 }
  0xd3   :  { %v489_v46 = vpop.f32.mrf.mxu0  ;;  %v513_v47 = vpop.f32.mrf.mxu1 }
  0xd4   :  { %378 = vst.msk [vmem:[%s809_s2 + $0x38] sm:$0xff] %vm45_vm1, %v489_v46  ;;  %394 = vst.msk [vmem:[%s809_s2 + $0xb8] sm:$0xff] %vm45_vm1, %v513_v47 }
  0xd5   :  { %v242_v48 = vpop.f32.mrf.mxu0  ;;  %v322_v49 = vpop.f32.mrf.mxu1 }
  0xd6   :  { %377 = vst.msk [vmem:[%s809_s2 + $0x30] sm:$0xff] %vm45_vm1, %v242_v48  ;;  %393 = vst.msk [vmem:[%s809_s2 + $0xb0] sm:$0xff] %vm45_vm1, %v322_v49 }
  0xd7   :  { %v492_v50 = vpop.f32.mrf.mxu0  ;;  %v516_v51 = vpop.f32.mrf.mxu1 }
  0xd8   :  { %380 = vst.msk [vmem:[%s809_s2 + $0x48] sm:$0xff] %vm45_vm1, %v492_v50  ;;  %396 = vst.msk [vmem:[%s809_s2 + $0xc8] sm:$0xff] %vm45_vm1, %v516_v51 }
  0xd9   :  { %v252_v52 = vpop.f32.mrf.mxu0  ;;  %v332_v53 = vpop.f32.mrf.mxu1 }
  0xda   :  { %379 = vst.msk [vmem:[%s809_s2 + $0x40] sm:$0xff] %vm45_vm1, %v252_v52  ;;  %395 = vst.msk [vmem:[%s809_s2 + $0xc0] sm:$0xff] %vm45_vm1, %v332_v53 }
  0xdb   :  { %v495_v54 = vpop.f32.mrf.mxu0  ;;  %v519_v55 = vpop.f32.mrf.mxu1 }
  0xdc   :  { %382 = vst.msk [vmem:[%s809_s2 + $0x58] sm:$0xff] %vm45_vm1, %v495_v54  ;;  %398 = vst.msk [vmem:[%s809_s2 + $0xd8] sm:$0xff] %vm45_vm1, %v519_v55 }
  0xdd   :  { %v262_v56 = vpop.f32.mrf.mxu0  ;;  %v342_v57 = vpop.f32.mrf.mxu1 }
  0xde   :  { %381 = vst.msk [vmem:[%s809_s2 + $0x50] sm:$0xff] %vm45_vm1, %v262_v56  ;;  %397 = vst.msk [vmem:[%s809_s2 + $0xd0] sm:$0xff] %vm45_vm1, %v342_v57 }
  0xdf   :  { %v498_v58 = vpop.f32.mrf.mxu0  ;;  %v522_v59 = vpop.f32.mrf.mxu1 }
  0xe0   :  { %384 = vst.msk [vmem:[%s809_s2 + $0x68] sm:$0xff] %vm45_vm1, %v498_v58  ;;  %400 = vst.msk [vmem:[%s809_s2 + $0xe8] sm:$0xff] %vm45_vm1, %v522_v59 }
  0xe1   :  { %v272_v60 = vpop.f32.mrf.mxu0  ;;  %v352_v61 = vpop.f32.mrf.mxu1 }
  0xe2   :  { %383 = vst.msk [vmem:[%s809_s2 + $0x60] sm:$0xff] %vm45_vm1, %v272_v60  ;;  %399 = vst.msk [vmem:[%s809_s2 + $0xe0] sm:$0xff] %vm45_vm1, %v352_v61 }
  0xe3   :  { %v501_v62 = vpop.f32.mrf.mxu0  ;;  %v525_v63 = vpop.f32.mrf.mxu1 }
  0xe4   :  { %386 = vst.msk [vmem:[%s809_s2 + $0x78] sm:$0xff] %vm45_vm1, %v501_v62  ;;  %402 = vst.msk [vmem:[%s809_s2 + $0xf8] sm:$0xff] %vm45_vm1, %v525_v63 }
  0xe5   :  { %v282_v0 = vpop.f32.mrf.mxu0  ;;  %v362_v1 = vpop.f32.mrf.mxu1 }
  0xe6   :  { %385 = vst.msk [vmem:[%s809_s2 + $0x70] sm:$0xff] %vm45_vm1, %v282_v0  ;;  %401 = vst.msk [vmem:[%s809_s2 + $0xf0] sm:$0xff] %vm45_vm1, %v362_v1 }

</bundles_post_ra>
